<compile_context>
chip_gen: v7x
topology: tpu7x:2x2x1
jax: 0.10.0
libtpu: 0.0.40
codegen_flags: <defaults>
</compile_context>

<pallas_src>
import functools

import numpy as np
import jax
import jax.numpy as jnp
from jax.experimental import pallas as pl
from jax.experimental.pallas import tpu as pltpu

KERNEL = 5
PAD = 2
ACT_BITS = 8
W_BITS = 8


# ----------------------------------------------------------------------------
# Pallas kernel: single live-tap GEMM + bias + dyadic dequant epilogue
# ----------------------------------------------------------------------------
def _ctx_gemm_dequant_kernel(x_ref, w_ref, b_ref, s_ref, o_ref):
    """One (TM, Cout) output tile per grid step.

    x_ref: (1, TM, K)    bf16  live-tap im2col integer activations (K = 12*Cin)
    w_ref: (K, Cout)     bf16  integer weights of the 12 live taps
    b_ref: (1, Cout)     f32   integer bias
    s_ref: (1, Cout)     f32   per-channel dyadic dequant multiplier
    o_ref: (1, TM, Cout) f32   dequantized, rounded output tile
    """
    acc = jnp.dot(x_ref[0], w_ref[...], preferred_element_type=jnp.float32)
    o_ref[0] = jnp.round((acc + b_ref[...]) * s_ref[...])


def masked_conv_dequant(x_cols, w_full, b_row, s_row, *, tm):
    bsz, p, k = x_cols.shape
    _, cout = w_full.shape
    assert p % tm == 0, (p, tm)
    return pl.pallas_call(
        _ctx_gemm_dequant_kernel,
        out_shape=jax.ShapeDtypeStruct((bsz, p, cout), jnp.float32),
        grid_spec=pltpu.PrefetchScalarGridSpec(
            num_scalar_prefetch=0,
            grid=(bsz, p // tm),
            in_specs=[
                pl.BlockSpec((1, tm, k), lambda b, m: (b, m, 0)),
                pl.BlockSpec((k, cout), lambda b, m: (0, 0)),
                pl.BlockSpec((1, cout), lambda b, m: (0, 0)),
                pl.BlockSpec((1, cout), lambda b, m: (0, 0)),
            ],
            out_specs=pl.BlockSpec((1, tm, cout), lambda b, m: (b, m, 0)),
        ),
        compiler_params=pltpu.CompilerParams(
            dimension_semantics=("parallel", "parallel"),
            vmem_limit_bytes=32 * 1024 * 1024),
    )(x_cols, w_full, b_row, s_row)


# ----------------------------------------------------------------------------
# HAWQ-style quantization glue (reconstructed semantics, all f32)
# ----------------------------------------------------------------------------
def quant_act_symmetric(x, bits=ACT_BITS):
    n = 2 ** (bits - 1) - 1
    scale = jnp.maximum(jnp.max(jnp.abs(x)) / n, 1e-8)
    x_int = jnp.clip(jnp.round(x / scale), -(n + 1), n)
    return x_int, scale


def quant_weight_per_channel(w, bits=W_BITS):
    n = 2 ** (bits - 1) - 1
    scale = jnp.max(jnp.abs(w.reshape(w.shape[0], -1)), axis=1) / n
    scale = jnp.maximum(scale, 1e-8)
    w_int = jnp.clip(jnp.round(w / scale[:, None, None, None]), -(n + 1), n)
    return w_int, scale


def batch_frexp(x, max_bit=31):
    # x = mant * 2**exp with mant in [0.5, 1); exact split via jnp.frexp.
    mant, exp = jnp.frexp(x)
    m_int = jnp.round(mant * (2.0 ** max_bit))
    return m_int, jnp.float32(max_bit) - exp.astype(jnp.float32)


# ----------------------------------------------------------------------------
# context_prediction forward
# ----------------------------------------------------------------------------
def context_prediction_forward(x, params, *, hs_left, active_taps, tm=128):
    # QuantAct (symmetric per-tensor)
    x_int, act_sf = quant_act_symmetric(x)

    # masked weight -> per-channel symmetric quantization (QuantConv2d)
    w = params["w"] * params["mask"]
    w_int, w_sf = quant_weight_per_channel(w)
    b_int = jnp.round(params["b"] / (act_sf * w_sf))             # (Cout,)

    # dyadic dequant multiplier, folded into the kernel epilogue:
    #   out = round(conv_int * m * 2**(hs_left - e))
    m, e = batch_frexp(act_sf * w_sf)
    dequant = m * jnp.exp2(hs_left - e)                          # (Cout,) f32

    bsz, cin, h, wdt = x.shape
    cout = w.shape[0]

    # Live-tap im2col (zero-pad is fused into the shifted slices by XLA):
    # lane-dense LHS with K = 12*Cin (= 768 at Cin=64), bf16 holds the 8-bit
    # integer values exactly.
    x_nhwc = jnp.transpose(x_int, (0, 2, 3, 1))                  # (B,H,W,Cin)
    x_pad = jnp.pad(x_nhwc, ((0, 0), (PAD, PAD), (PAD, PAD), (0, 0)))
    cols = [x_pad[:, kh:kh + h, kw:kw + wdt, :] for kh, kw in active_taps]
    x_cols = jnp.concatenate(cols, axis=-1)                      # (B,H,W,12*Cin)
    x_cols = x_cols.reshape(bsz, h * wdt, len(active_taps) * cin).astype(jnp.bfloat16)

    # Matching weight slab: rows ordered identically to the im2col columns.
    w_hwio = jnp.transpose(w_int, (2, 3, 1, 0))                  # (5,5,Cin,Cout)
    w_full = jnp.concatenate([w_hwio[kh, kw] for kh, kw in active_taps],
                             axis=0).astype(jnp.bfloat16)        # (12*Cin,Cout)

    out = masked_conv_dequant(
        x_cols, w_full,
        b_int.reshape(1, cout).astype(jnp.float32),
        dequant.reshape(1, cout).astype(jnp.float32),
        tm=min(tm, h * wdt))                                     # (B, H*W, Cout)
    # Module contract is NCHW; a NHWC consumer could skip this transpose.
    return out.reshape(bsz, h, wdt, cout).transpose(0, 3, 1, 2)


# Pure-JAX reference (XLA conv) for a correctness sanity check.
def reference_forward(x, params, hs_left):
    x_int, act_sf = quant_act_symmetric(x)
    w = params["w"] * params["mask"]
    w_int, w_sf = quant_weight_per_channel(w)
    b_int = jnp.round(params["b"] / (act_sf * w_sf))
    conv = jax.lax.conv_general_dilated(
        x_int, w_int, window_strides=(1, 1),
        padding=((PAD, PAD), (PAD, PAD)),
        dimension_numbers=("NCHW", "OIHW", "NCHW"),
        precision=jax.lax.Precision.HIGHEST)
    conv = conv + b_int[None, :, None, None]
    m, e = batch_frexp(act_sf * w_sf)
    return jnp.round(conv * (m * jnp.exp2(hs_left - e))[None, :, None, None])


# ----------------------------------------------------------------------------
# main
# ----------------------------------------------------------------------------
if __name__ == "__main__":
    key = jax.random.PRNGKey(0)
    ks = jax.random.split(key, 3)

    M = 64                      # latent channels; context model emits 2*M
    B, H, W = 2, 16, 16
    COUT = 2 * M                # 128 -> lane-dense output
    HS_LEFT = 16.0

    x = jax.random.normal(ks[0], (B, M, H, W), dtype=jnp.float32)

    # causal type-'A' mask of the JAHP context model (stands in for model.mask)
    mask_np = np.ones((COUT, M, KERNEL, KERNEL), np.float32)
    mask_np[:, :, KERNEL // 2, KERNEL // 2:] = 0.0
    mask_np[:, :, KERNEL // 2 + 1:, :] = 0.0
    active_taps = tuple(
        (kh, kw) for kh in range(KERNEL) for kw in range(KERNEL)
        if mask_np[:, :, kh, kw].any())          # 12 of 25 taps survive the mask

    params = {
        "w": 0.05 * jax.random.normal(ks[1], (COUT, M, KERNEL, KERNEL), jnp.float32),
        "b": 0.01 * jax.random.normal(ks[2], (COUT,), jnp.float32),
        "mask": jnp.asarray(mask_np),
    }

    fwd = jax.jit(functools.partial(
        context_prediction_forward, hs_left=HS_LEFT, active_taps=active_taps))
    out = jax.block_until_ready(fwd(x, params))

    assert out.shape == (B, COUT, H, W), out.shape
    assert out.dtype == jnp.float32

    ref = reference_forward(x, params, HS_LEFT)
    max_err = float(jnp.max(jnp.abs(out - ref)))
    assert max_err <= 1.0, f"mismatch vs XLA reference: {max_err}"

    print("KERNEL_OK")
</pallas_src>

<mosaic_0001>
module attributes {stable_mosaic.version = 11 : i64} {
  func.func @_ctx_gemm_dequant_kernel(%arg0: i32, %arg1: i32, %arg2: memref<1x128x768xbf16, #tpu.memory_space<vmem>>, %arg3: memref<768x128xbf16, #tpu.memory_space<vmem>>, %arg4: memref<1x128xf32, #tpu.memory_space<vmem>>, %arg5: memref<1x128xf32, #tpu.memory_space<vmem>>, %arg6: memref<1x128x128xf32, #tpu.memory_space<vmem>>) attributes {dimension_semantics = [#tpu.dimension_semantics<parallel>, #tpu.dimension_semantics<parallel>], iteration_bounds = array<i64: 2, 2>, scalar_prefetch = 0 : i64, scratch_operands = 0 : i64, tpu.core_type = #tpu.core_type<tc>, window_params = [{transform_indices = @transform_0, window_bounds = array<i64: 1, 128, 768>}, {pipeline_mode = #tpu.pipeline_mode<synchronous>, transform_indices = @transform_1, window_bounds = array<i64: 768, 128>}, {pipeline_mode = #tpu.pipeline_mode<synchronous>, transform_indices = @transform_2, window_bounds = array<i64: 1, 128>}, {pipeline_mode = #tpu.pipeline_mode<synchronous>, transform_indices = @transform_3, window_bounds = array<i64: 1, 128>}, {transform_indices = @transform_4, window_bounds = array<i64: 1, 128, 128>}]} {
    %c0 = arith.constant 0 : index
    %c0_0 = arith.constant 0 : index
    %c0_1 = arith.constant 0 : index
    %0 = vector.load %arg2[%c0, %c0_0, %c0_1] : memref<1x128x768xbf16, #tpu.memory_space<vmem>>, vector<1x128x768xbf16>
    %1 = vector.shape_cast %0 : vector<1x128x768xbf16> to vector<128x768xbf16>
    %c0_2 = arith.constant 0 : index
    %c0_3 = arith.constant 0 : index
    %2 = vector.load %arg3[%c0_2, %c0_3] : memref<768x128xbf16, #tpu.memory_space<vmem>>, vector<768x128xbf16>
    %cst = arith.constant dense<0.000000e+00> : vector<128x128xf32>
    %3 = tpu.matmul %1, %2, %cst {dimension_numbers = #tpu.dot_dimension_numbers<[1], [0], [0], [1], [0, 0, 1, 1], [], []>} : vector<128x768xbf16>, vector<768x128xbf16>, vector<128x128xf32> -> vector<128x128xf32>
    %c0_4 = arith.constant 0 : index
    %c0_5 = arith.constant 0 : index
    %4 = vector.load %arg4[%c0_4, %c0_5] : memref<1x128xf32, #tpu.memory_space<vmem>>, vector<1x128xf32>
    %5 = vector.broadcast %4 : vector<1x128xf32> to vector<128x128xf32>
    %6 = arith.addf %3, %5 : vector<128x128xf32>
    %c0_6 = arith.constant 0 : index
    %c0_7 = arith.constant 0 : index
    %7 = vector.load %arg5[%c0_6, %c0_7] : memref<1x128xf32, #tpu.memory_space<vmem>>, vector<1x128xf32>
    %8 = vector.broadcast %7 : vector<1x128xf32> to vector<128x128xf32>
    %9 = arith.mulf %6, %8 : vector<128x128xf32>
    %10 = math.roundeven %9 : vector<128x128xf32>
    %c0_8 = arith.constant 0 : index
    %c0_9 = arith.constant 0 : index
    %c0_10 = arith.constant 0 : index
    %11 = vector.load %arg6[%c0_8, %c0_9, %c0_10] : memref<1x128x128xf32, #tpu.memory_space<vmem>>, vector<1x128x128xf32>
    %12 = vector.shape_cast %11 : vector<1x128x128xf32> to vector<128x128xf32>
    %13 = vector.shape_cast %10 : vector<128x128xf32> to vector<1x128x128xf32>
    tpu.vector_store %arg6[%c0_8, %c0_9, %c0_10], %13 {strides = array<i32>} : memref<1x128x128xf32, #tpu.memory_space<vmem>>, vector<1x128x128xf32>,
    return
  }
  func.func @transform_0(%arg0: i32, %arg1: i32) -> (i32, i32, i32) {
    %c0_i32 = arith.constant 0 : i32
    %c0_i32_0 = arith.constant 0 : i32
    return %arg0, %arg1, %c0_i32 : i32, i32, i32
  }
  func.func @transform_1(%arg0: i32, %arg1: i32) -> (i32, i32) {
    %c0_i32 = arith.constant 0 : i32
    %c0_i32_0 = arith.constant 0 : i32
    %c0_i32_1 = arith.constant 0 : i32
    return %c0_i32, %c0_i32_0 : i32, i32
  }
  func.func @transform_2(%arg0: i32, %arg1: i32) -> (i32, i32) {
    %c0_i32 = arith.constant 0 : i32
    %c0_i32_0 = arith.constant 0 : i32
    %c0_i32_1 = arith.constant 0 : i32
    return %c0_i32, %c0_i32_0 : i32, i32
  }
  func.func @transform_3(%arg0: i32, %arg1: i32) -> (i32, i32) {
    %c0_i32 = arith.constant 0 : i32
    %c0_i32_0 = arith.constant 0 : i32
    %c0_i32_1 = arith.constant 0 : i32
    return %c0_i32, %c0_i32_0 : i32, i32
  }
  func.func @transform_4(%arg0: i32, %arg1: i32) -> (i32, i32, i32) {
    %c0_i32 = arith.constant 0 : i32
    %c0_i32_0 = arith.constant 0 : i32
    return %arg0, %arg1, %c0_i32 : i32, i32, i32
  }
}

</mosaic_0001>

<bundles_post_ra>
// kernel: context_prediction_forward.1
= control target key start
LH: loop header
LB: loop body
LE: loop exit
PB: predicated region body
PF: predicated region fallthrough
CT: control target
= control target key end

     0   :  { %9 = vsyncpa [#allocation3], 0  ;;  %s2450_s0 = inlined_call_operand.vmem [shape: bf16[2,256,768], index: 0, kind: input, shape index: {}]   ;;  %s2451_s1 = inlined_call_operand.vmem [shape: bf16[768,128], index: 1, kind: input, shape index: {}]   ;;  %s2452_s2 = inlined_call_operand.vmem [shape: f32[1,128], index: 2, kind: input, shape index: {}]   ;;  %s2453_s3 = inlined_call_operand.vmem [shape: f32[1,128], index: 3, kind: input, shape index: {}]   ;;  %s2454_s4 = inlined_call_operand.hbm [shape: f32[2,256,128], index: 4, kind: output, shape index: {}]  }
   0x1   :  { %11 = vsyncpa [#allocation3 + $0x1], 0  ;;  %s2012_s15 = smov 0   ;;  %s2014_s16 = smov 0  }
   0x2   :  { %s2016_s17 = smov 0   ;;  %s2018_s18 = smov 0  }
   0x3   :  { %s2020_s19 = smov 0   ;;  %s2022_s20 = smov 0  }
   0x4   :  { %s2024_s21 = smov 0   ;;  %s2026_s22 = smov 0  }
   0x5 LB: > { %s1357_s23 = sadd.s32 4294967295, %s1982_s22   ;;  %s1358_s24 = sadd.s32 4294967294, %s1982_s22   ;;  %s1982_s22 = sphi %s2026_s22, %s17_s22   ;;  %s1978_s21 = sphi %s2024_s21, %s2463_s21   ;;  %s1974_s20 = sphi %s2022_s20, %s2462_s20   ;;  %s1970_s19 = sphi %s2020_s19, %s2461_s19   ;;  %s1966_s18 = sphi %s2018_s18, %s2460_s18   ;;  %s1962_s17 = sphi %s2016_s17, %s2459_s17   ;;  %s1958_s16 = sphi %s2014_s16, %s2458_s16   ;;  %s1954_s15 = sphi %s2012_s15, %s2457_s15  }
   0x6   : > { %s26_s25 = sadd.s32 1, %s1974_s20  ;;  %s29_s26 = sadd.s32 1, %s1978_s21 }
   0x7   : > { %p27_p0 = scmp.ge.s32.totalorder %s26_s25, 2  ;;  %p139_p1 = scmp.ne.s32.totalorder %s1962_s17, %s1958_s16 }
   0x8   : > { %p140_p2 = scmp.eq.s32.totalorder %s1357_s23, 3  ;;  %p145_p5 = scmp.ne.s32.totalorder %s1958_s16, %s1954_s15 }
   0x9   : > { %s2465_s25 = smov (%p27_p0, %s26_s25), 0  ;;  %s2467_s26 = smov (!%p27_p0, %s29_s26), %s1978_s21 }
   0xa   : > { %s125_s27 = ssub.s32 %s1974_s20, %s2465_s25  ;;  %p2063_p3 = por %p140_p2, %p139_p1 }
   0xb   : > { %p31_p4 = scmp.ge.s32.totalorder %s2467_s26, 2  ;;  %p146_p6 = scmp.eq.s32.totalorder %s1358_s24, 3 }
   0xc   : > { %p1361_p7 = scmp.ge.s32.totalorder %s1982_s22, 1  ;;  %p187_p9 = scmp.lt.s32.totalorder %s1982_s22, 5 }
   0xd   : > { %s2469_s26 = smov (%p31_p4, %s2467_s26), 0  ;;  %p2072_p8 = por %p146_p6, %p145_p5 }
   0xe   : > { %s124_s30 = ssub.s32 %s1978_s21, %s2469_s26  ;;  %s129_s5 = sadd.s32 1, %s1962_s17 }
   0xf   : > { %s126_s6 = sor.u32 %s125_s27, %s124_s30  ;;  %p188_p10 = pnand %p1361_p7, %p187_p9 }
  0x10   : > { %p127_p11 = scmp.eq.s32.totalorder %s126_s6, 0  ;;  %v1768_v0 = vld [vmem:[%s2451_s1 + $0x40] sm:$0xff] (!%p188_p10)   ;;  %s2087_s10 = sshll.u32 (!%p188_p10), %s1966_s18, 4  ;;  %v1770_v2 = vld [vmem:[%s2451_s1 + $0x48] sm:$0xff] (!%p188_p10)   ;;  %v1772_v4 = vld [vmem:[%s2451_s1 + $0x50] sm:$0xff] (!%p188_p10)  }
  0x11   : > { %191 = sbr.rel (%p188_p10) target bundleno = 378 (0x17a), region = 36  ;;  %v1769_v1 = vld [vmem:[%s2451_s1] sm:$0xff] (!%p188_p10)   ;;  %p219_p12 = scmp.lt.s32.totalorder (!%p188_p10), %s1970_s19, 1  ;;  %1469 = vmatprep.subr.bf16.mxu0 (!%p188_p10), %v1768_v0  ;;  %1661 = vmatprep.subr.bf16.mxu1 (!%p188_p10), %v1768_v0  ;;  %v1771_v3 = vld [vmem:[%s2451_s1 + $0x8] sm:$0xff] (!%p188_p10)   ;;  %v1773_v5 = vld [vmem:[%s2451_s1 + $0x10] sm:$0xff] (!%p188_p10)  }
  0x12   : > { %s2081_s7 = scalar_select %p127_p11, %s1962_s17, %s129_s5  }
  0x13   : > { %p221_p13 = scmp.lt.s32.totalorder (!%p188_p10), %s2087_s10, 31  ;;  %1470 = vmatpush3.bf16.msra.mxu0 (!%p188_p10), %v1769_v1  ;;  %1669 = vmatpush3.bf16.msra.mxu1 (!%p188_p10), %v1769_v1  ;;  %v1774_v6 = vld [vmem:[%s2451_s1 + $0x58] sm:$0xff] (!%p188_p10)   ;;  %v1776_v8 = vld [vmem:[%s2451_s1 + $0x60] sm:$0xff] (!%p188_p10)   ;;  %v1778_v10 = vld [vmem:[%s2451_s1 + $0x68] sm:$0xff] (!%p188_p10)   ;;  %s1984_s24 = smov (!%p188_p10), [#allocation2]  }
  0x14   : > { %1471 = vmatprep.subr.bf16.mxu0 (!%p188_p10), %v1770_v2  ;;  %1662 = vmatprep.subr.bf16.mxu1 (!%p188_p10), %v1770_v2  ;;  %v1775_v7 = vld [vmem:[%s2451_s1 + $0x18] sm:$0xff] (!%p188_p10)   ;;  %v1777_v9 = vld [vmem:[%s2451_s1 + $0x20] sm:$0xff] (!%p188_p10)   ;;  %v1779_v13 = vld [vmem:[%s2451_s1 + $0x28] sm:$0xff] (!%p188_p10)   ;;  %s1892_s27 = sshll.u32 (!%p188_p10), %s1984_s24, 4  ;;  %s1893_s27 = int_to_ptr.vmem [resolvable:$false] %s1892_s27 }
  0x15   : > { %v1780_v14 = vld [vmem:[%s2451_s1 + $0x70] sm:$0xff] (!%p188_p10)   ;;  %v1782_v16 = vld [vmem:[%s2451_s1 + $0x78] sm:$0xff] (!%p188_p10)   ;;  %v1790_v20 = vld [vmem:[%s2451_s1 + $0xc0] sm:$0xff] (!%p188_p10)   ;;  %s1894_s30 = scalar_lea.vmem (!%p188_p10), %s1893_s27, 4096 }
  0x16   : > { %v1781_v15 = vld [vmem:[%s2451_s1 + $0x30] sm:$0xff] (!%p188_p10)   ;;  %v1783_v17 = vld [vmem:[%s2451_s1 + $0x38] sm:$0xff] (!%p188_p10)   ;;  %v1791_v21 = vld [vmem:[%s2451_s1 + $0x140] sm:$0xff] (!%p188_p10)  }
  0x17   : > { %1472 = vmatpush3.bf16.msra.mxu0 (!%p188_p10), %v1771_v3  ;;  %1670 = vmatpush3.bf16.msra.mxu1 (!%p188_p10), %v1771_v3  ;;  %v1792_v22 = vld [vmem:[%s2451_s1 + $0x80] sm:$0xff] (!%p188_p10)   ;;  %v1794_v24 = vld [vmem:[%s2451_s1 + $0xc8] sm:$0xff] (!%p188_p10)   ;;  %v1804_v30 = vld [vmem:[%s2451_s1 + $0xd0] sm:$0xff] (!%p188_p10)  }
  0x18   : > { %s220_s18 = scalar_select %p219_p12, %s1970_s19, 1  ;;  %1473 = vmatprep.subr.bf16.mxu0 %v1772_v4  ;;  %1663 = vmatprep.subr.bf16.mxu1 %v1772_v4  ;;  %v1793_v23 = vld [vmem:[%s2451_s1 + $0x100] sm:$0xff]   ;;  %v1795_v25 = vld [vmem:[%s2451_s1 + $0x148] sm:$0xff]   ;;  %v1805_v32 = vld [vmem:[%s2451_s1 + $0x150] sm:$0xff]  }
  0x19   : > { %s222_s5 = scalar_select %p221_p13, %s2087_s10, 31  ;;  %v1796_v27 = vld [vmem:[%s2451_s1 + $0x88] sm:$0xff]   ;;  %v1806_v34 = vld [vmem:[%s2451_s1 + $0x90] sm:$0xff]   ;;  %v1808_v36 = vld [vmem:[%s2451_s1 + $0xd8] sm:$0xff]  }
  0x1a   : > { %s1678_s6 = smul.u32 192, %s220_s18  ;;  %v1797_v29 = vld [vmem:[%s2451_s1 + $0x108] sm:$0xff]   ;;  %v1807_v35 = vld [vmem:[%s2451_s1 + $0x110] sm:$0xff]   ;;  %v1809_v37 = vld [vmem:[%s2451_s1 + $0x158] sm:$0xff]  }
  0x1b   : > { %s1677_s8 = smul.u32 6, %s222_s5  ;;  %1474 = vmatpush3.bf16.msra.mxu0 %v1773_v5  ;;  %1671 = vmatpush3.bf16.msra.mxu1 %v1773_v5  ;;  %v1810_v39 = vld [vmem:[%s2451_s1 + $0x98] sm:$0xff]   ;;  %v1818_v42 = vld [vmem:[%s2451_s1 + $0xe0] sm:$0xff]   ;;  %v1822_v48 = vld [vmem:[%s2451_s1 + $0xe8] sm:$0xff]  }
  0x1c   : > { %1475 = vmatprep.subr.bf16.mxu0 %v1774_v6  ;;  %1664 = vmatprep.subr.bf16.mxu1 %v1774_v6  ;;  %v1811_v41 = vld [vmem:[%s2451_s1 + $0x118] sm:$0xff]   ;;  %v1819_v45 = vld [vmem:[%s2451_s1 + $0x160] sm:$0xff]   ;;  %v1823_v49 = vld [vmem:[%s2451_s1 + $0x168] sm:$0xff]  }
  0x1d   : > { %s225_s14 = sadd.s32 %s1678_s6, %s1677_s8  ;;  %v1820_v46 = vld [vmem:[%s2451_s1 + $0xa0] sm:$0xff]   ;;  %v1824_v52 = vld [vmem:[%s2451_s1 + $0xa8] sm:$0xff]   ;;  %v1832_v54 = vld [vmem:[%s2451_s1 + $0xf0] sm:$0xff]   ;;  %s1465_s6 = sshll.u32 %s1970_s19, 5 }
  0x1e   : > { %s1364_s18 = sshll.u32 %s225_s14, 2  ;;  %v1821_v47 = vld [vmem:[%s2451_s1 + $0x120] sm:$0xff]   ;;  %v1825_v53 = vld [vmem:[%s2451_s1 + $0x128] sm:$0xff]   ;;  %v1833_v57 = vld [vmem:[%s2451_s1 + $0x170] sm:$0xff]   ;;  %s1269_s8 = sadd.s32 %s1465_s6, %s2087_s10 }
  0x1f   : > { %s2120_s11 = scalar_lea.vmem %s2450_s0, %s1364_s18  ;;  %1476 = vmatpush3.bf16.msra.mxu0 %v1775_v7  ;;  %1672 = vmatpush3.bf16.msra.mxu1 %v1775_v7  ;;  %v1834_v58 = vld [vmem:[%s2451_s1 + $0xb0] sm:$0xff]   ;;  %v1836_v60 = vld [vmem:[%s2451_s1 + $0xf8] sm:$0xff]   ;;  %s215_s18 = sand.u32 1, %s1958_s16  }
  0x20   : > { %1477 = vmatprep.subr.bf16.mxu0 %v1776_v8  ;;  %1665 = vmatprep.subr.bf16.mxu1 %v1776_v8  ;;  %v1786_v11 = vld [vmem:[%s2120_s11 + $0x4] ss:$24 sps:$4 sm:$0xff]   ;;  %v1784_v18 = vld [vmem:[%s2120_s11] ss:$24 sps:$4 sm:$0xff]   ;;  %v1798_v26 = vld [vmem:[%s2120_s11 + $0x34] ss:$24 sps:$4 sm:$0xff]  }
  0x21   : > { %v1789_v12 = vld [vmem:[%s2120_s11 + $0xc4] ss:$24 sps:$4 sm:$0xff]   ;;  %942 = vmatprep.mubr.bf16.mxu0 %v1786_v11  ;;  %v1787_v19 = vld [vmem:[%s2120_s11 + $0xc0] ss:$24 sps:$4 sm:$0xff]   ;;  %v1800_v28 = vld [vmem:[%s2120_s11 + $0xf4] ss:$24 sps:$4 sm:$0xff]  }
  0x22   : > { %974 = vmatprep.mubr.bf16.mxu1 %v1789_v12  ;;  %v1802_v31 = vld [vmem:[%s2120_s11 + $0x30] ss:$24 sps:$4 sm:$0xff]   ;;  %v1812_v38 = vld [vmem:[%s2120_s11 + $0x64] ss:$24 sps:$4 sm:$0xff]   ;;  %v1816_v43 = vld [vmem:[%s2120_s11 + $0x60] ss:$24 sps:$4 sm:$0xff]  }
  0x23   : > { %1478 = vmatpush3.bf16.msra.mxu0 %v1777_v9  ;;  %1673 = vmatpush3.bf16.msra.mxu1 %v1777_v9  ;;  %v1803_v33 = vld [vmem:[%s2120_s11 + $0xf0] ss:$24 sps:$4 sm:$0xff]   ;;  %v1814_v40 = vld [vmem:[%s2120_s11 + $0x124] ss:$24 sps:$4 sm:$0xff]   ;;  %v1817_v44 = vld [vmem:[%s2120_s11 + $0x120] ss:$24 sps:$4 sm:$0xff]  }
  0x24   : > { %1479 = vmatprep.subr.bf16.mxu0 %v1778_v10  ;;  %1666 = vmatprep.subr.bf16.mxu1 %v1778_v10  ;;  %v1826_v50 = vld [vmem:[%s2120_s11 + $0x94] ss:$24 sps:$4 sm:$0xff]   ;;  %v1830_v55 = vld [vmem:[%s2120_s11 + $0x90] ss:$24 sps:$4 sm:$0xff]   ;;  %v1837_v61 = vld [vmem:[%s2451_s1 + $0x178] sm:$0xff]   ;;  %s1362_s5 = sshll.u32 %s215_s18, 7 }
  0x25   : > { %v1828_v51 = vld [vmem:[%s2120_s11 + $0x154] ss:$24 sps:$4 sm:$0xff]   ;;  %v1831_v56 = vld [vmem:[%s2120_s11 + $0x150] ss:$24 sps:$4 sm:$0xff]   ;;  %v1838_v62 = vld [vmem:[%s2451_s1 + $0xb8] sm:$0xff]   ;;  %s2330_s9 = scalar_lea.vmem [#allocation2], %s1362_s5 }
  0x26   : > { %v1835_v59 = vld [vmem:[%s2451_s1 + $0x130] sm:$0xff]   ;;  %v1839_v63 = vld [vmem:[%s2451_s1 + $0x138] sm:$0xff]   ;;  %v1842_v0 = vld [vmem:[%s2120_s11 + $0xc] ss:$24 sps:$4 sm:$0xff]   ;;  %s1466_s19 = sshll.u32 %s1269_s8, 7  ;;  %s1272_s12 = sshll.u32 %s2330_s9, 4  ;;  %s2392_s12 = int_to_ptr.vmem [resolvable:$true] %s1272_s12 }
  0x27   : > { %1480 = vmatpush3.bf16.msra.mxu0 %v1779_v13  ;;  %1674 = vmatpush3.bf16.msra.mxu1 %v1779_v13  ;;  %v1840_v1 = vld [vmem:[%s2120_s11 + $0x8] ss:$24 sps:$4 sm:$0xff]   ;;  %v1845_v2 = vld [vmem:[%s2120_s11 + $0x14] ss:$24 sps:$4 sm:$0xff]   ;;  %v1848_v5 = vld [vmem:[%s2120_s11 + $0x44] ss:$24 sps:$4 sm:$0xff]   ;;  %s2390_s23 = scalar_lea.hbm %s2454_s4, %s1466_s19  ;;  %p1895_p4 = scmp.lt.s32.totalorder %s2392_s12, %s1893_s27 }
  0x28   : > { %1481 = vmatprep.subr.bf16.mxu0 %v1780_v14  ;;  %1667 = vmatprep.subr.bf16.mxu1 %v1780_v14  ;;  %v1843_v3 = vld [vmem:[%s2120_s11 + $0x10] ss:$24 sps:$4 sm:$0xff]   ;;  %v1846_v4 = vld [vmem:[%s2120_s11 + $0x3c] ss:$24 sps:$4 sm:$0xff]   ;;  %v1851_v7 = vld [vmem:[%s2120_s11 + $0x40] ss:$24 sps:$4 sm:$0xff]  }
  0x29   : > { %v1850_v6 = vld [vmem:[%s2120_s11 + $0x38] ss:$24 sps:$4 sm:$0xff]   ;;  %v1852_v8 = vld [vmem:[%s2120_s11 + $0x6c] ss:$24 sps:$4 sm:$0xff]   ;;  %v1856_v10 = vld [vmem:[%s2120_s11 + $0x68] ss:$24 sps:$4 sm:$0xff]  }
  0x2a   : > { %v1854_v9 = vld [vmem:[%s2120_s11 + $0x74] ss:$24 sps:$4 sm:$0xff]   ;;  %v1857_v11 = vld [vmem:[%s2120_s11 + $0x70] ss:$24 sps:$4 sm:$0xff]   ;;  %v1860_v13 = vld [vmem:[%s2120_s11 + $0xa4] ss:$24 sps:$4 sm:$0xff]  }
  0x2b   : > { %1482 = vmatpush3.bf16.msra.mxu0 %v1781_v15  ;;  %1675 = vmatpush3.bf16.msra.mxu1 %v1781_v15  ;;  %v1858_v12 = vld [vmem:[%s2120_s11 + $0x9c] ss:$24 sps:$4 sm:$0xff]   ;;  %v1862_v14 = vld [vmem:[%s2120_s11 + $0x98] ss:$24 sps:$4 sm:$0xff]   ;;  %s2398_s10 = scalar_lea.sflag [#allocation3], %s215_s18 }
  0x2c   : > { %1483 = vmatprep.subr.bf16.mxu0 %v1782_v16  ;;  %1668 = vmatprep.subr.bf16.mxu1 %v1782_v16  ;;  %v1863_v15 = vld [vmem:[%s2120_s11 + $0xa0] ss:$24 sps:$4 sm:$0xff]   ;;  %v1864_v16 = vld [vmem:[%s2120_s11 + $0xcc] ss:$24 sps:$4 sm:$0xff]  }
  0x2f   : > { %1484 = vmatpush3.bf16.msra.mxu0 %v1783_v17  ;;  %1676 = vmatpush3.bf16.msra.mxu1 %v1783_v17  ;;  %v1866_v17 = vld [vmem:[%s2120_s11 + $0xd4] ss:$24 sps:$4 sm:$0xff]  }
  0x30   : > { %1533 = vmatprep.subr.bf16.mxu1 %v1790_v20  ;;  %1597 = vmatprep.subr.bf16.mxu0 %v1791_v21  ;;  %v1870_v20 = vld [vmem:[%s2120_s11 + $0xfc] ss:$24 sps:$4 sm:$0xff]  }
  0x31   : > { %v1872_v21 = vld [vmem:[%s2120_s11 + $0x104] ss:$24 sps:$4 sm:$0xff]  }
  0x32   : > { %943 = vmatmul.mubr.bf16.vlgmr.msra.gmra.mrb[0].mxu0 %v1784_v18  ;;  %975 = vmatmul.mubr.bf16.vlgmr.msra.gmra.mrb[0].mxu1 %v1787_v19  ;;  %v1868_v18 = vld [vmem:[%s2120_s11 + $0xc8] ss:$24 sps:$4 sm:$0xff]  }
  0x33   : > { %1534 = vmatpush3.bf16.msra.mxu1 %v1792_v22  ;;  %1598 = vmatpush3.bf16.msra.mxu0 %v1793_v23  ;;  %v1869_v19 = vld [vmem:[%s2120_s11 + $0xd0] ss:$24 sps:$4 sm:$0xff]   ;;  %v1875_v23 = vld [vmem:[%s2120_s11 + $0x100] ss:$24 sps:$4 sm:$0xff]  }
  0x34   : > { %1535 = vmatprep.subr.bf16.mxu1 %v1794_v24  ;;  %1599 = vmatprep.subr.bf16.mxu0 %v1795_v25  ;;  %v1874_v22 = vld [vmem:[%s2120_s11 + $0xf8] ss:$24 sps:$4 sm:$0xff]   ;;  %v1876_v24 = vld [vmem:[%s2120_s11 + $0x12c] ss:$24 sps:$4 sm:$0xff]  }
  0x35   : > { %950 = vmatprep.mubr.bf16.mxu0 %v1798_v26  ;;  %982 = vmatprep.mubr.bf16.mxu1 %v1800_v28  ;;  %v1878_v25 = vld [vmem:[%s2120_s11 + $0x134] ss:$24 sps:$4 sm:$0xff]   ;;  %v1880_v26 = vld [vmem:[%s2120_s11 + $0x128] ss:$24 sps:$4 sm:$0xff]  }
  0x36   : > { %v1882_v28 = vld [vmem:[%s2120_s11 + $0x15c] ss:$24 sps:$4 sm:$0xff]  }
  0x37   : > { %1536 = vmatpush3.bf16.msra.mxu1 %v1796_v27  ;;  %1600 = vmatpush3.bf16.msra.mxu0 %v1797_v29  ;;  %v1881_v27 = vld [vmem:[%s2120_s11 + $0x130] ss:$24 sps:$4 sm:$0xff]   ;;  %v1884_v29 = vld [vmem:[%s2120_s11 + $0x164] ss:$24 sps:$4 sm:$0xff]  }
  0x38   : > { %1537 = vmatprep.subr.bf16.mxu1 %v1804_v30  ;;  %1601 = vmatprep.subr.bf16.mxu0 %v1805_v32  ;;  %v1886_v30 = vld [vmem:[%s2120_s11 + $0x158] ss:$24 sps:$4 sm:$0xff]  }
  0x3a   : > { %951 = vmatmul.mubr.bf16.gmra.mrb[4].mxu0 %v1802_v31  ;;  %983 = vmatmul.mubr.bf16.gmra.mrb[4].mxu1 %v1803_v33  ;;  %v1887_v31 = vld [vmem:[%s2120_s11 + $0x160] ss:$24 sps:$4 sm:$0xff]   ;;  %s1888_s11 = scalar_lea.vmem %s2392_s12, 2048 }
  0x3b   : > { %1538 = vmatpush3.bf16.msra.mxu1 %v1806_v34  ;;  %1602 = vmatpush3.bf16.msra.mxu0 %v1807_v35  ;;  %p1889_p0 = scmp.ne.s32.totalorder %s2392_s12, %s1888_s11  ;;  %p1896_p5 = scmp.lt.s32.totalorder %s1894_s30, %s1888_s11 }
  0x3c   : > { %1539 = vmatprep.subr.bf16.mxu1 %v1808_v36  ;;  %1603 = vmatprep.subr.bf16.mxu0 %v1809_v37 }
  0x3d   : > { %958 = vmatprep.mubr.bf16.mxu0 %v1812_v38  ;;  %990 = vmatprep.mubr.bf16.mxu1 %v1814_v40  ;;  %p1890_p1 = pnand %p1889_p0, %p2063_p3  ;;  %p1897_p6 = por %p1896_p5, %p1895_p4 }
  0x3f   : > { %1540 = vmatpush3.bf16.msra.mxu1 %v1810_v39  ;;  %1604 = vmatpush3.bf16.msra.mxu0 %v1811_v41  ;;  %p1891_p2 = pneg %p1890_p1 }
  0x40   : > { %1541 = vmatprep.subr.bf16.mxu1 %v1818_v42  ;;  %1605 = vmatprep.subr.bf16.mxu0 %v1819_v45 }
  0x41   : > { %p1898_p7 = pnand %p1897_p6, %p1891_p2 }
  0x42   : > { %959 = vmatmul.mubr.bf16.gmra.mrb[8].mxu0 %v1816_v43  ;;  %991 = vmatmul.mubr.bf16.gmra.mrb[8].mxu1 %v1817_v44 }
  0x43   : > { %1542 = vmatpush3.bf16.msra.mxu1 %v1820_v46  ;;  %1606 = vmatpush3.bf16.msra.mxu0 %v1821_v47 }
  0x44   : > { %1543 = vmatprep.subr.bf16.mxu1 %v1822_v48  ;;  %1607 = vmatprep.subr.bf16.mxu0 %v1823_v49 }
  0x45   : > { %966 = vmatprep.mubr.bf16.mxu0 %v1826_v50  ;;  %998 = vmatprep.mubr.bf16.mxu1 %v1828_v51 }
  0x47   : > { %1544 = vmatpush3.bf16.msra.mxu1 %v1824_v52  ;;  %1608 = vmatpush3.bf16.msra.mxu0 %v1825_v53 }
  0x48   : > { %1545 = vmatprep.subr.bf16.mxu1 %v1832_v54  ;;  %1609 = vmatprep.subr.bf16.mxu0 %v1833_v57 }
  0x4a   : > { %967 = vmatmul.mubr.bf16.gmra.mrb[12].mxu0 %v1830_v55  ;;  %999 = vmatmul.mubr.bf16.gmra.mrb[12].mxu1 %v1831_v56 }
  0x4b   : > { %1546 = vmatpush3.bf16.msra.mxu1 %v1834_v58  ;;  %1610 = vmatpush3.bf16.msra.mxu0 %v1835_v59 }
  0x4c   : > { %1547 = vmatprep.subr.bf16.mxu1 %v1836_v60  ;;  %1611 = vmatprep.subr.bf16.mxu0 %v1837_v61 }
  0x4d   : > { %1039 = vmatprep.mubr.bf16.mxu1 %v1842_v0  ;;  %1136 = vmatprep.mubr.bf16.mxu0 %v1845_v2 }
  0x4f   : > { %1548 = vmatpush3.bf16.msra.mxu1 %v1838_v62  ;;  %1612 = vmatpush3.bf16.msra.mxu0 %v1839_v63 }
  0x52   : > { %1040 = vmatmul.mubr.bf16.vlgmr.msra.gmra.mrb[16].mxu1 %v1840_v1  ;;  %1137 = vmatmul.mubr.bf16.vlgmr.msra.gmra.mrb[16].mxu0 %v1843_v3 }
  0x53   : > { %1047 = vmatprep.mubr.bf16.mxu1 %v1846_v4  ;;  %1144 = vmatprep.mubr.bf16.mxu0 %v1848_v5 }
  0x5a   : > { %1048 = vmatmul.mubr.bf16.gmra.mrb[20].mxu1 %v1850_v6  ;;  %1145 = vmatmul.mubr.bf16.gmra.mrb[20].mxu0 %v1851_v7 }
  0x5b   : > { %1055 = vmatprep.mubr.bf16.mxu1 %v1852_v8  ;;  %1152 = vmatprep.mubr.bf16.mxu0 %v1854_v9 }
  0x62   : > { %1056 = vmatmul.mubr.bf16.gmra.mrb[24].mxu1 %v1856_v10  ;;  %1153 = vmatmul.mubr.bf16.gmra.mrb[24].mxu0 %v1857_v11 }
  0x63   : > { %1063 = vmatprep.mubr.bf16.mxu1 %v1858_v12  ;;  %1160 = vmatprep.mubr.bf16.mxu0 %v1860_v13 }
  0x6a   : > { %1064 = vmatmul.mubr.bf16.gmra.mrb[28].mxu1 %v1862_v14  ;;  %1161 = vmatmul.mubr.bf16.gmra.mrb[28].mxu0 %v1863_v15 }
  0x6b   : > { %1071 = vmatprep.mubr.bf16.mxu1 %v1864_v16  ;;  %1168 = vmatprep.mubr.bf16.mxu0 %v1866_v17  ;;  %v2314_v16 = vld [vmem:[%s2452_s2] ss:$0 sm:$0xff] }
  0x72   : > { %1072 = vmatmul.mubr.bf16.gmra.mrb[32].mxu1 %v1868_v18  ;;  %1169 = vmatmul.mubr.bf16.gmra.mrb[32].mxu0 %v1869_v19 }
  0x73   : > { %1079 = vmatprep.mubr.bf16.mxu1 %v1870_v20  ;;  %1176 = vmatprep.mubr.bf16.mxu0 %v1872_v21 }
  0x7a   : > { %1080 = vmatmul.mubr.bf16.gmra.mrb[36].mxu1 %v1874_v22  ;;  %1177 = vmatmul.mubr.bf16.gmra.mrb[36].mxu0 %v1875_v23 }
  0x7b   : > { %1087 = vmatprep.mubr.bf16.mxu1 %v1876_v24  ;;  %1184 = vmatprep.mubr.bf16.mxu0 %v1878_v25 }
  0x82   : > { %1088 = vmatmul.mubr.bf16.gmra.mrb[40].mxu1 %v1880_v26  ;;  %1185 = vmatmul.mubr.bf16.gmra.mrb[40].mxu0 %v1881_v27 }
  0x83   : > { %1095 = vmatprep.mubr.bf16.mxu1 %v1882_v28  ;;  %1192 = vmatprep.mubr.bf16.mxu0 %v1884_v29 }
  0x8a   : > { %1096 = vmatmul.mubr.bf16.gmra.mrb[44].mxu1 %v1886_v30  ;;  %1193 = vmatmul.mubr.bf16.gmra.mrb[44].mxu0 %v1887_v31 }
 0x105   : > { %v1485_v32 = vpop.f32.mrb[0].mxu0  ;;  %v1509_v33 = vpop.f32.mrb[0].mxu1 }
 0x106   : > { %v1486_v34 = vpop.f32.mrb[1].mxu0  ;;  %v1510_v35 = vpop.f32.mrb[1].mxu1 }
 0x107   : > { %v1487_v36 = vadd.f32 %v1486_v34, %v1485_v32  ;;  %v2287_v37 = vadd.f32 %v1510_v35, %v1509_v33  ;;  %v1488_v38 = vpop.f32.mrb[2].mxu0  ;;  %v1512_v39 = vpop.f32.mrb[2].mxu1  ;;  %v2322_v32 = vld [vmem:[%s2453_s3] ss:$0 sm:$0xff] }
 0x108   : > { %v1489_v40 = vpop.f32.mrb[3].mxu0  ;;  %v1513_v41 = vpop.f32.mrb[3].mxu1 }
 0x109   : > { %v1490_v42 = vadd.f32 %v1489_v40, %v1488_v38  ;;  %v2289_v43 = vadd.f32 %v1513_v41, %v1512_v39  ;;  %v945_v21 = vadd.f32 %v1487_v36, %v2314_v16 }
 0x10b   : > { %v948_v28 = vadd.f32 %v1490_v42, %v2314_v16 }
 0x10d   : > { %v1491_v44 = vpop.f32.mrb[4].mxu0  ;;  %v1515_v45 = vpop.f32.mrb[4].mxu1 }
 0x10e   : > { %v1492_v46 = vpop.f32.mrb[5].mxu0  ;;  %v1516_v47 = vpop.f32.mrb[5].mxu1 }
 0x10f   : > { %v1493_v48 = vadd.f32 %v1492_v46, %v1491_v44  ;;  %v2291_v49 = vadd.f32 %v1516_v47, %v1515_v45  ;;  %v1494_v50 = vpop.f32.mrb[6].mxu0  ;;  %v1518_v51 = vpop.f32.mrb[6].mxu1 }
 0x110   : > { %v1495_v52 = vpop.f32.mrb[7].mxu0  ;;  %v1519_v53 = vpop.f32.mrb[7].mxu1 }
 0x111   : > { %v1496_v54 = vadd.f32 %v1495_v52, %v1494_v50  ;;  %v2293_v55 = vadd.f32 %v1519_v53, %v1518_v51  ;;  %v953_v40 = vadd.f32 %v1493_v48, %v2314_v16 }
 0x113   : > { %v956_v52 = vadd.f32 %v1496_v54, %v2314_v16 }
 0x115   : > { %v1497_v56 = vpop.f32.mrb[8].mxu0  ;;  %v1521_v57 = vpop.f32.mrb[8].mxu1 }
 0x116   : > { %v1498_v58 = vpop.f32.mrb[9].mxu0  ;;  %v1522_v59 = vpop.f32.mrb[9].mxu1 }
 0x117   : > { %v2295_v60 = vadd.f32 %v1498_v58, %v1497_v56  ;;  %v2297_v61 = vadd.f32 %v1522_v59, %v1521_v57  ;;  %v1500_v62 = vpop.f32.mrb[10].mxu0  ;;  %v1524_v63 = vpop.f32.mrb[10].mxu1 }
 0x118   : > { %v1501_v0 = vpop.f32.mrb[11].mxu0  ;;  %v1525_v1 = vpop.f32.mrb[11].mxu1 }
 0x119   : > { %v2299_v2 = vadd.f32 %v1501_v0, %v1500_v62  ;;  %v2301_v3 = vadd.f32 %v1525_v1, %v1524_v63 }
 0x11d   : > { %v1503_v4 = vpop.f32.mrb[12].mxu0  ;;  %v1527_v5 = vpop.f32.mrb[12].mxu1 }
 0x11e   : > { %v1504_v6 = vpop.f32.mrb[13].mxu0  ;;  %v1528_v7 = vpop.f32.mrb[13].mxu1 }
 0x11f   : > { %v2303_v8 = vadd.f32 %v1504_v6, %v1503_v4  ;;  %v2305_v9 = vadd.f32 %v1528_v7, %v1527_v5  ;;  %v1506_v10 = vpop.f32.mrb[14].mxu0  ;;  %v1530_v11 = vpop.f32.mrb[14].mxu1  ;;  %v961_v5 = vadd.f32 %v2295_v60, %v2314_v16 }
 0x120   : > { %v1507_v12 = vpop.f32.mrb[15].mxu0  ;;  %v1531_v13 = vpop.f32.mrb[15].mxu1 }
 0x121   : > { %v2307_v14 = vadd.f32 %v1507_v12, %v1506_v10  ;;  %v2309_v15 = vadd.f32 %v1531_v13, %v1530_v11 }
 0x125   : > { %v1549_v17 = vpop.f32.mrb[16].mxu1  ;;  %v1613_v18 = vpop.f32.mrb[16].mxu0 }
 0x126   : > { %v1550_v19 = vpop.f32.mrb[17].mxu1  ;;  %v1614_v20 = vpop.f32.mrb[17].mxu0 }
 0x127   : > { %v1551_v22 = vadd.f32 %v1550_v19, %v1549_v17  ;;  %v1615_v23 = vadd.f32 %v1614_v20, %v1613_v18  ;;  %v1552_v24 = vpop.f32.mrb[18].mxu1  ;;  %v1616_v25 = vpop.f32.mrb[18].mxu0  ;;  %v964_v19 = vadd.f32 %v2299_v2, %v2314_v16 }
 0x128   : > { %v1553_v26 = vpop.f32.mrb[19].mxu1  ;;  %v1617_v27 = vpop.f32.mrb[19].mxu0 }
 0x129   : > { %v1042_v29 = vadd.f32 %v1551_v22, %v945_v21  ;;  %v1554_v30 = vadd.f32 %v1553_v26, %v1552_v24  ;;  %v1618_v31 = vadd.f32 %v1617_v27, %v1616_v25 }
 0x12b   : > { %v1139_v33 = vadd.f32 %v1615_v23, %v1042_v29  ;;  %v1045_v34 = vadd.f32 %v1554_v30, %v948_v28 }
 0x12d   : > { %v1208_v35 = vmul.f32 %v2322_v32, %v1139_v33  ;;  %v1142_v36 = vadd.f32 %v1618_v31, %v1045_v34  ;;  %v1555_v38 = vpop.f32.mrb[20].mxu1  ;;  %v1619_v39 = vpop.f32.mrb[20].mxu0  ;;  %v969_v31 = vadd.f32 %v2303_v8, %v2314_v16 }
 0x12e   : > { %v1556_v41 = vpop.f32.mrb[21].mxu1  ;;  %v1620_v42 = vpop.f32.mrb[21].mxu0 }
 0x12f   : > { %v1679_v44 = vround.rtne.f32 %v1208_v35  ;;  %v1209_v45 = vmul.f32 %v2322_v32, %v1142_v36  ;;  %v1557_v46 = vadd.f32 %v1556_v41, %v1555_v38  ;;  %v1621_v47 = vadd.f32 %v1620_v42, %v1619_v39  ;;  %v1558_v50 = vpop.f32.mrb[22].mxu1  ;;  %v1622_v51 = vpop.f32.mrb[22].mxu0 }
 0x130   : > { %v1559_v53 = vpop.f32.mrb[23].mxu1  ;;  %v1623_v56 = vpop.f32.mrb[23].mxu0  ;;  %v972_v41 = vadd.f32 %v2307_v14, %v2314_v16 }
 0x131   : > { %1240 = vst [vmem:[%s2330_s9] sm:$0xff] %v1679_v44  ;;  %v1680_v57 = vround.rtne.f32 %v1209_v45  ;;  %v1050_v48 = vadd.f32 %v1557_v46, %v953_v40  ;;  %v1560_v58 = vadd.f32 %v1559_v53, %v1558_v50  ;;  %v1624_v59 = vadd.f32 %v1623_v56, %v1622_v51 }
 0x133   : > { %1241 = vst [vmem:[%s2330_s9 + $0x8] sm:$0xff] %v1680_v57  ;;  %v1147_v62 = vadd.f32 %v1621_v47, %v1050_v48  ;;  %v1053_v63 = vadd.f32 %v1560_v58, %v956_v52  ;;  %v977_v48 = vadd.f32 %v2287_v37, %v2314_v16 }
 0x135   : > { %v1210_v0 = vmul.f32 %v2322_v32, %v1147_v62  ;;  %v1150_v1 = vadd.f32 %v1624_v59, %v1053_v63  ;;  %v1561_v4 = vpop.f32.mrb[24].mxu1  ;;  %v1625_v54 = vpop.f32.mrb[24].mxu0 }
 0x136   : > { %v1562_v6 = vpop.f32.mrb[25].mxu1  ;;  %v1626_v7 = vpop.f32.mrb[25].mxu0 }
 0x137   : > { %v1681_v10 = vround.rtne.f32 %v1210_v0  ;;  %v1211_v11 = vmul.f32 %v2322_v32, %v1150_v1  ;;  %v1563_v12 = vadd.f32 %v1562_v6, %v1561_v4  ;;  %v1627_v13 = vadd.f32 %v1626_v7, %v1625_v54  ;;  %v1564_v17 = vpop.f32.mrb[26].mxu1  ;;  %v1628_v18 = vpop.f32.mrb[26].mxu0 }
 0x138   : > { %v1565_v20 = vpop.f32.mrb[27].mxu1  ;;  %v1629_v21 = vpop.f32.mrb[27].mxu0  ;;  %v980_v54 = vadd.f32 %v2289_v43, %v2314_v16 }
 0x139   : > { %1242 = vst [vmem:[%s2330_s9 + $0x10] sm:$0xff] %v1681_v10  ;;  %v1682_v22 = vround.rtne.f32 %v1211_v11  ;;  %v1058_v23 = vadd.f32 %v1563_v12, %v961_v5  ;;  %v1566_v24 = vadd.f32 %v1565_v20, %v1564_v17  ;;  %v1630_v60 = vadd.f32 %v1629_v21, %v1628_v18 }
 0x13a   : > { %v985_v21 = vadd.f32 %v2291_v49, %v2314_v16 }
 0x13b   : > { %1243 = vst [vmem:[%s2330_s9 + $0x18] sm:$0xff] %v1682_v22  ;;  %v1155_v25 = vadd.f32 %v1627_v13, %v1058_v23  ;;  %v1061_v26 = vadd.f32 %v1566_v24, %v964_v19 }
 0x13d   : > { %v1212_v27 = vmul.f32 %v2322_v32, %v1155_v25  ;;  %v1158_v28 = vadd.f32 %v1630_v60, %v1061_v26  ;;  %v1567_v29 = vpop.f32.mrb[28].mxu1  ;;  %v1631_v30 = vpop.f32.mrb[28].mxu0 }
 0x13e   : > { %v1568_v2 = vpop.f32.mrb[29].mxu1  ;;  %v1632_v33 = vpop.f32.mrb[29].mxu0 }
 0x13f   : > { %v1683_v34 = vround.rtne.f32 %v1212_v27  ;;  %v1213_v35 = vmul.f32 %v2322_v32, %v1158_v28  ;;  %v1569_v36 = vadd.f32 %v1568_v2, %v1567_v29  ;;  %v1633_v38 = vadd.f32 %v1632_v33, %v1631_v30  ;;  %v1570_v39 = vpop.f32.mrb[30].mxu1  ;;  %v1634_v40 = vpop.f32.mrb[30].mxu0 }
 0x140   : > { %v1571_v42 = vpop.f32.mrb[31].mxu1  ;;  %v1635_v44 = vpop.f32.mrb[31].mxu0  ;;  %v988_v28 = vadd.f32 %v2293_v55, %v2314_v16 }
 0x141   : > { %1244 = vst [vmem:[%s2330_s9 + $0x20] sm:$0xff] %v1683_v34  ;;  %v1684_v45 = vround.rtne.f32 %v1213_v35  ;;  %v1066_v46 = vadd.f32 %v1569_v36, %v969_v31  ;;  %v1572_v47 = vadd.f32 %v1571_v42, %v1570_v39  ;;  %v1636_v8 = vadd.f32 %v1635_v44, %v1634_v40 }
 0x143   : > { %1245 = vst [vmem:[%s2330_s9 + $0x28] sm:$0xff] %v1684_v45  ;;  %v1163_v50 = vadd.f32 %v1633_v38, %v1066_v46  ;;  %v1069_v51 = vadd.f32 %v1572_v47, %v972_v41  ;;  %v993_v41 = vadd.f32 %v2297_v61, %v2314_v16 }
 0x145   : > { %v1214_v52 = vmul.f32 %v2322_v32, %v1163_v50  ;;  %v1166_v53 = vadd.f32 %v1636_v8, %v1069_v51  ;;  %v1573_v56 = vpop.f32.mrb[32].mxu1  ;;  %v1637_v57 = vpop.f32.mrb[32].mxu0  ;;  %v996_v51 = vadd.f32 %v2301_v3, %v2314_v16  ;;  %v1001_v3 = vadd.f32 %v2305_v9, %v2314_v16 }
 0x146   : > { %v1574_v14 = vpop.f32.mrb[33].mxu1  ;;  %v1638_v58 = vpop.f32.mrb[33].mxu0 }
 0x147   : > { %v1685_v59 = vround.rtne.f32 %v1214_v52  ;;  %v1215_v62 = vmul.f32 %v2322_v32, %v1166_v53  ;;  %v1575_v63 = vadd.f32 %v1574_v14, %v1573_v56  ;;  %v1639_v0 = vadd.f32 %v1638_v58, %v1637_v57  ;;  %v1576_v1 = vpop.f32.mrb[34].mxu1  ;;  %v1640_v4 = vpop.f32.mrb[34].mxu0 }
 0x148   : > { %v1577_v5 = vpop.f32.mrb[35].mxu1  ;;  %v1641_v6 = vpop.f32.mrb[35].mxu0 }
 0x149   : > { %1246 = vst [vmem:[%s2330_s9 + $0x30] sm:$0xff] %v1685_v59  ;;  %v1686_v7 = vround.rtne.f32 %v1215_v62  ;;  %v1074_v10 = vadd.f32 %v1575_v63, %v977_v48  ;;  %v1578_v11 = vadd.f32 %v1577_v5, %v1576_v1  ;;  %v1642_v37 = vadd.f32 %v1641_v6, %v1640_v4 }
 0x14b   : > { %1247 = vst [vmem:[%s2330_s9 + $0x38] sm:$0xff] %v1686_v7  ;;  %v1171_v12 = vadd.f32 %v1639_v0, %v1074_v10  ;;  %v1077_v13 = vadd.f32 %v1578_v11, %v980_v54 }
 0x14d   : > { %v1216_v17 = vmul.f32 %v2322_v32, %v1171_v12  ;;  %v1174_v18 = vadd.f32 %v1642_v37, %v1077_v13  ;;  %v1579_v19 = vpop.f32.mrb[36].mxu1  ;;  %v1643_v20 = vpop.f32.mrb[36].mxu0  ;;  %v1004_v37 = vadd.f32 %v2309_v15, %v2314_v16 }
 0x14e   : > { %v1580_v43 = vpop.f32.mrb[37].mxu1  ;;  %v1644_v22 = vpop.f32.mrb[37].mxu0 }
 0x14f   : > { %v1687_v23 = vround.rtne.f32 %v1216_v17  ;;  %v1217_v24 = vmul.f32 %v2322_v32, %v1174_v18  ;;  %v1581_v60 = vadd.f32 %v1580_v43, %v1579_v19  ;;  %v1645_v25 = vadd.f32 %v1644_v22, %v1643_v20  ;;  %v1582_v26 = vpop.f32.mrb[38].mxu1  ;;  %v1646_v27 = vpop.f32.mrb[38].mxu0 }
 0x150   : > { %v1583_v29 = vpop.f32.mrb[39].mxu1  ;;  %v1647_v30 = vpop.f32.mrb[39].mxu0 }
 0x151   : > { %1248 = vst [vmem:[%s2330_s9 + $0x40] sm:$0xff] %v1687_v23  ;;  %v1688_v31 = vround.rtne.f32 %v1217_v24  ;;  %v1082_v2 = vadd.f32 %v1581_v60, %v985_v21  ;;  %v1584_v33 = vadd.f32 %v1583_v29, %v1582_v26  ;;  %v1648_v49 = vadd.f32 %v1647_v30, %v1646_v27 }
 0x153   : > { %1249 = vst [vmem:[%s2330_s9 + $0x48] sm:$0xff] %v1688_v31  ;;  %v1179_v34 = vadd.f32 %v1645_v25, %v1082_v2  ;;  %v1085_v35 = vadd.f32 %v1584_v33, %v988_v28 }
 0x155   : > { %v1218_v36 = vmul.f32 %v2322_v32, %v1179_v34  ;;  %v1182_v38 = vadd.f32 %v1648_v49, %v1085_v35  ;;  %v1585_v39 = vpop.f32.mrb[40].mxu1  ;;  %v1649_v40 = vpop.f32.mrb[40].mxu0 }
 0x156   : > { %v1586_v55 = vpop.f32.mrb[41].mxu1  ;;  %v1650_v42 = vpop.f32.mrb[41].mxu0 }
 0x157   : > { %v1689_v44 = vround.rtne.f32 %v1218_v36  ;;  %v1219_v45 = vmul.f32 %v2322_v32, %v1182_v38  ;;  %v1587_v46 = vadd.f32 %v1586_v55, %v1585_v39  ;;  %v1651_v47 = vadd.f32 %v1650_v42, %v1649_v40  ;;  %v1588_v8 = vpop.f32.mrb[42].mxu1  ;;  %v1652_v50 = vpop.f32.mrb[42].mxu0 }
 0x158   : > { %v1589_v52 = vpop.f32.mrb[43].mxu1  ;;  %v1653_v53 = vpop.f32.mrb[43].mxu0 }
 0x159   : > { %1250 = vst [vmem:[%s2330_s9 + $0x50] sm:$0xff] %v1689_v44  ;;  %v1690_v56 = vround.rtne.f32 %v1219_v45  ;;  %v1090_v57 = vadd.f32 %v1587_v46, %v993_v41  ;;  %v1590_v48 = vadd.f32 %v1589_v52, %v1588_v8  ;;  %v1654_v61 = vadd.f32 %v1653_v53, %v1652_v50 }
 0x15b   : > { %1251 = vst [vmem:[%s2330_s9 + $0x58] sm:$0xff] %v1690_v56  ;;  %v1187_v14 = vadd.f32 %v1651_v47, %v1090_v57  ;;  %v1093_v58 = vadd.f32 %v1590_v48, %v996_v51 }
 0x15d   : > { %v1220_v59 = vmul.f32 %v2322_v32, %v1187_v14  ;;  %v1190_v62 = vadd.f32 %v1654_v61, %v1093_v58  ;;  %v1591_v63 = vpop.f32.mrb[44].mxu1  ;;  %v1655_v0 = vpop.f32.mrb[44].mxu0 }
 0x15e   : > { %v1592_v1 = vpop.f32.mrb[45].mxu1  ;;  %v1656_v4 = vpop.f32.mrb[45].mxu0 }
 0x15f   : > { %v1691_v54 = vround.rtne.f32 %v1220_v59  ;;  %v1221_v5 = vmul.f32 %v2322_v32, %v1190_v62  ;;  %v1593_v6 = vadd.f32 %v1592_v1, %v1591_v63  ;;  %v1657_v7 = vadd.f32 %v1656_v4, %v1655_v0  ;;  %v1594_v10 = vpop.f32.mrb[46].mxu1  ;;  %v1658_v11 = vpop.f32.mrb[46].mxu0 }
 0x160   : > { %v1595_v12 = vpop.f32.mrb[47].mxu1  ;;  %v1659_v13 = vpop.f32.mrb[47].mxu0 }
 0x161   : > { %1252 = vst [vmem:[%s2330_s9 + $0x60] sm:$0xff] %v1691_v54  ;;  %v1692_v9 = vround.rtne.f32 %v1221_v5  ;;  %v1098_v17 = vadd.f32 %v1593_v6, %v1001_v3  ;;  %v1596_v18 = vadd.f32 %v1595_v12, %v1594_v10  ;;  %v1660_v19 = vadd.f32 %v1659_v13, %v1658_v11 }
 0x163   : > { %1253 = vst [vmem:[%s2330_s9 + $0x68] sm:$0xff] %v1692_v9  ;;  %v1195_v20 = vadd.f32 %v1657_v7, %v1098_v17  ;;  %v1101_v21 = vadd.f32 %v1596_v18, %v1004_v37 }
 0x165   : > { %v1222_v43 = vmul.f32 %v2322_v32, %v1195_v20  ;;  %v1198_v22 = vadd.f32 %v1660_v19, %v1101_v21 }
 0x167   : > { %v1693_v15 = vround.rtne.f32 %v1222_v43  ;;  %v1223_v16 = vmul.f32 %v2322_v32, %v1198_v22 }
 0x169   : > { %1254 = vst [vmem:[%s2330_s9 + $0x70] sm:$0xff] %v1693_v15  ;;  %v1694_v23 = vround.rtne.f32 %v1223_v16 }
 0x16b   : > { %1255 = vst [vmem:[%s2330_s9 + $0x78] sm:$0xff] %v1694_v23 }
 0x16c   : > { %1901 = shalt.err (!%p1898_p7)
}
 0x16d   : > { %s1902_s18 = scalar_lea.hbm %s2390_s23, 2048  ;;  %s1906_s6 = scalar_lea.hbm %s2454_s4, 8192 }
 0x16e   : > { %p1903_p9 = scmp.ne.s32.totalorder %s2390_s23, %s1902_s18  ;;  %p1907_p12 = scmp.lt.u32.totalorder %s2390_s23, %s2454_s4 }
 0x16f   : > { %p1908_p13 = scmp.lt.u32.totalorder %s1906_s6, %s1902_s18  ;;  %p1910_p1 = scmp.lt.u32.totalorder %s1902_s18, %s2390_s23 }
 0x170   : > { %p1904_p10 = pnand %p1903_p9, %p2063_p3 }
 0x171   : > { %p1909_p0 = por %p1908_p13, %p1907_p12 }
 0x172   : > { %p1905_p11 = pneg %p1904_p10 }
 0x173   : > { %p1911_p2 = por %p1910_p1, %p1909_p0 }
 0x175   : > { %p1912_p4 = pnand %p1911_p2, %p1905_p11 }
 0x177   : > { %1915 = shalt.err (!%p1912_p4)
}
 0x178   : > { %s1985_s13 = smov 128   ;;  %s1986_s14 = smov 8  }
 0x179   : > { %1695 = dma.vmem_to_hbm [thread:$0]  (%p2063_p3), %s2392_s12, 2048, %s2390_s23, %s2398_s10, %s1985_s13, %s1985_s13, %s1986_s14  }
 0x17a PF: > { %p1701_p5 = scmp.ge.s32.totalorder %s1982_s22, 2  ;;  %s1287_s11 = sand.u32 1, %s1954_s15  }
 0x17b   : > { %s1288_s24 = scalar_lea.sflag [#allocation3], %s1287_s11 }
 0x17c   : > { %p1698_p6 = pnand %p1701_p5, %p2072_p8 }
 0x17e   : > { %1949 = dma.done.wait (!%p1698_p6), %s1288_s24, 2048  }
 0x17f   : > { %1951 = vsyncadd (!%p1698_p6), %s1288_s24, 4294965248  ;;  %s17_s22 = sadd.s32 1, %s1982_s22   ;;  %s2457_s15 = smov %s1958_s16 }
 0x180   : > { %p14_p7 = scmp.ge.s32.totalorder %s17_s22, 6   ;;  %s2458_s16 = smov %s1962_s17 }
 0x181   : > { %s2459_s17 = smov %s2081_s7  ;;  %s2460_s18 = smov %s1974_s20 }
 0x182   : > { %s2461_s19 = smov %s1978_s21  ;;  %s2462_s20 = smov %s2465_s25 }
 0x183   : > { %s2463_s21 = smov %s2469_s26  ;;  %16 = sbr.rel (!%p14_p7) target bundleno = 5 (0x5), region = 71 }
 0x18a   :  { %1293 = vsyncpa [#allocation3], 1 }
 0x18b   :  { %1295 = vsyncpa [#allocation3 + $0x1], 1 }

</bundles_post_ra>
